<compile_context>
chip_gen: v7x
topology: tpu7x:2x2x1
jax: 0.10.0
libtpu: 0.0.40
codegen_flags: <defaults>
</compile_context>

<pallas_src>
import jax
import jax.numpy as jnp
from jax.experimental import pallas as pl
from jax.experimental.pallas import tpu as pltpu


def _logreg_kernel(x_ref, w_ref, b_ref, o_ref):
    # x_ref: (TB, Kc)   VMEM, pipelined per grid step
    # w_ref: (Kc, Nc)   VMEM-resident (pre-transposed / block-diagonal)
    # b_ref: (1,  Nc)   VMEM-resident
    # o_ref: (TB, Nc)   VMEM, pipelined per grid step
    z = jnp.dot(x_ref[...], w_ref[...], preferred_element_type=jnp.float32)
    z = z + b_ref[...]
    # sigmoid(z) = 0.5 * tanh(0.5*z) + 0.5 : one EUP op, stable for all z.
    y = 0.5 * jnp.tanh(0.5 * z) + 0.5
    o_ref[...] = y.astype(o_ref.dtype)


def _pick_block_rows(Bg, in_cols, out_cols, dtype_bytes):
    """Pick the batch tile (rows of the packed problem) and a VMEM limit.

    Sized by bytes: double-buffered x/out tiles + resident W/b must fit under a
    generation-aware VMEM budget (v7x has only 64 MiB per TensorCore)."""
    try:
        vmem_cap = pltpu.get_tpu_info().vmem_capacity_bytes
    except Exception:  # pragma: no cover - conservative fallback
        vmem_cap = 64 << 20
    # Leave headroom for compiler-internal scratch; never ask for more than
    # ~96 MiB even on 128 MiB parts.
    vmem_limit = min(96 << 20, max(32 << 20, vmem_cap - (16 << 20)))
    budget = vmem_limit - (8 << 20)

    resident = (in_cols * out_cols + out_cols) * dtype_bytes      # W + b
    per_row = 2 * (in_cols + out_cols) * dtype_bytes              # 2 bufs x+out
    tb = (budget - resident) // max(per_row, 1)
    tb = int(max(8, min(tb, 32768)))
    if Bg <= 8:
        # Single block spanning the whole (small) row axis: block dim == full
        # array dim is always legal.
        return Bg, vmem_limit
    tb = min(tb, Bg)
    return max(8, (tb // 8) * 8), vmem_limit


def logistic_regression_forward(x, weight, bias):
    """x: [B, IN] f32, weight: [OUT, IN] f32 (PyTorch layout), bias: [OUT] f32."""
    B, IN = x.shape
    OUT, IN2 = weight.shape
    assert IN == IN2

    # Row packing: fold P batch rows into one output row so the last dim of
    # every pipelined tensor is a full 128-lane register.
    if 0 < OUT < 128 and 128 % OUT == 0 and B % (128 // OUT) == 0:
        P = 128 // OUT
    else:
        P = 1
    Bg = B // P
    Kc = P * IN
    Nc = P * OUT

    # TODO(synk): in production, build w_packed/b_packed once at init instead
    # of per call (they only depend on the parameters).
    wt = weight.T.astype(x.dtype)                                  # [IN, OUT]
    if P == 1:
        w_packed = wt
        b_packed = bias.astype(x.dtype).reshape(1, Nc)
        x_packed = x
    else:
        eye = jnp.eye(P, dtype=wt.dtype)
        # Block-diagonal weight: block (p, p) == W^T, zeros elsewhere.
        w_packed = jnp.einsum("pq,io->piqo", eye, wt).reshape(Kc, Nc)
        b_packed = jnp.tile(bias.astype(x.dtype), P).reshape(1, Nc)
        x_packed = x.reshape(Bg, Kc)            # contiguous -> free reshape

    dtype_bytes = jnp.dtype(x.dtype).itemsize
    TB, vmem_limit = _pick_block_rows(Bg, Kc, Nc, dtype_bytes)

    out = pl.pallas_call(
        _logreg_kernel,
        out_shape=jax.ShapeDtypeStruct((Bg, Nc), x.dtype),
        grid_spec=pltpu.PrefetchScalarGridSpec(
            num_scalar_prefetch=0,
            grid=(pl.cdiv(Bg, TB),),
            in_specs=[
                pl.BlockSpec((TB, Kc), lambda i: (i, 0)),   # x: pipelined
                pl.BlockSpec((Kc, Nc), lambda i: (0, 0)),   # W: resident
                pl.BlockSpec((1, Nc), lambda i: (0, 0)),    # b: resident
            ],
            out_specs=pl.BlockSpec((TB, Nc), lambda i: (i, 0)),
        ),
        compiler_params=pltpu.CompilerParams(
            # Batch rows are independent -> shard across v7x's 2 TensorCores.
            dimension_semantics=("parallel",),
            vmem_limit_bytes=int(vmem_limit),
        ),
    )(x_packed, w_packed, b_packed)

    # Contiguous row-major reshape back to (B, OUT): free metadata op.
    return out.reshape(B, OUT)


if __name__ == "__main__":
    # Small, module-consistent shapes: batch=8, input_size=32, output_size=16.
    B, INPUT_SIZE, OUTPUT_SIZE = 8, 32, 16

    key = jax.random.PRNGKey(0)
    kx, kw, kb = jax.random.split(key, 3)

    # Deterministic init mirroring nn.Linear's uniform(-1/sqrt(in), 1/sqrt(in)).
    bound = 1.0 / jnp.sqrt(jnp.float32(INPUT_SIZE))
    weight = jax.random.uniform(kw, (OUTPUT_SIZE, INPUT_SIZE),
                                dtype=jnp.float32, minval=-bound, maxval=bound)
    bias = jax.random.uniform(kb, (OUTPUT_SIZE,),
                              dtype=jnp.float32, minval=-bound, maxval=bound)
    x = jax.random.normal(kx, (B, INPUT_SIZE), dtype=jnp.float32)

    out = logistic_regression_forward(x, weight, bias)
    out = jax.block_until_ready(out)

    # Pure-JAX reference (same math as torch.sigmoid(linear(x))).
    ref = jax.nn.sigmoid(x @ weight.T + bias)
    assert out.shape == (B, OUTPUT_SIZE)
    assert jnp.allclose(out, ref, atol=2e-4, rtol=2e-4), (
        float(jnp.max(jnp.abs(out - ref))))

    print("KERNEL_OK")
</pallas_src>

<mosaic_0001>
module attributes {stable_mosaic.version = 11 : i64} {
  func.func @_logreg_kernel(%arg0: i32, %arg1: memref<1x256xf32, #tpu.memory_space<vmem>>, %arg2: memref<256x128xf32, #tpu.memory_space<vmem>>, %arg3: memref<1x128xf32, #tpu.memory_space<vmem>>, %arg4: memref<1x128xf32, #tpu.memory_space<vmem>>) attributes {dimension_semantics = [#tpu.dimension_semantics<parallel>], iteration_bounds = array<i64: 1>, scalar_prefetch = 0 : i64, scratch_operands = 0 : i64, tpu.core_type = #tpu.core_type<tc>, window_params = [{transform_indices = @transform_0, window_bounds = array<i64: 1, 256>}, {pipeline_mode = #tpu.pipeline_mode<synchronous>, transform_indices = @transform_1, window_bounds = array<i64: 256, 128>}, {pipeline_mode = #tpu.pipeline_mode<synchronous>, transform_indices = @transform_2, window_bounds = array<i64: 1, 128>}, {transform_indices = @transform_3, window_bounds = array<i64: 1, 128>}]} {
    %c0 = arith.constant 0 : index
    %c0_0 = arith.constant 0 : index
    %0 = vector.load %arg1[%c0, %c0_0] : memref<1x256xf32, #tpu.memory_space<vmem>>, vector<1x256xf32>
    %c0_1 = arith.constant 0 : index
    %c0_2 = arith.constant 0 : index
    %1 = vector.load %arg2[%c0_1, %c0_2] : memref<256x128xf32, #tpu.memory_space<vmem>>, vector<256x128xf32>
    %cst = arith.constant dense<0.000000e+00> : vector<1x128xf32>
    %2 = tpu.matmul %0, %1, %cst {dimension_numbers = #tpu.dot_dimension_numbers<[1], [0], [0], [1], [0, 0, 1, 1], [], []>} : vector<1x256xf32>, vector<256x128xf32>, vector<1x128xf32> -> vector<1x128xf32>
    %c0_3 = arith.constant 0 : index
    %c0_4 = arith.constant 0 : index
    %3 = vector.load %arg3[%c0_3, %c0_4] : memref<1x128xf32, #tpu.memory_space<vmem>>, vector<1x128xf32>
    %4 = arith.addf %2, %3 : vector<1x128xf32>
    %cst_5 = arith.constant 5.000000e-01 : f32
    %5 = vector.broadcast %cst_5 : f32 to vector<1x128xf32>
    %6 = arith.mulf %5, %4 : vector<1x128xf32>
    %7 = math.tanh %6 : vector<1x128xf32>
    %cst_6 = arith.constant 5.000000e-01 : f32
    %8 = vector.broadcast %cst_6 : f32 to vector<1x128xf32>
    %9 = arith.mulf %8, %7 : vector<1x128xf32>
    %cst_7 = arith.constant 5.000000e-01 : f32
    %10 = vector.broadcast %cst_7 : f32 to vector<1x128xf32>
    %11 = arith.addf %9, %10 : vector<1x128xf32>
    %c0_8 = arith.constant 0 : index
    %c0_9 = arith.constant 0 : index
    %12 = vector.load %arg4[%c0_8, %c0_9] : memref<1x128xf32, #tpu.memory_space<vmem>>, vector<1x128xf32>
    tpu.vector_store %arg4[%c0_8, %c0_9], %11 {strides = array<i32>} : memref<1x128xf32, #tpu.memory_space<vmem>>, vector<1x128xf32>,
    return
  }
  func.func @transform_0(%arg0: i32) -> (i32, i32) {
    %c0_i32 = arith.constant 0 : i32
    %c0_i32_0 = arith.constant 0 : i32
    return %arg0, %c0_i32 : i32, i32
  }
  func.func @transform_1(%arg0: i32) -> (i32, i32) {
    %c0_i32 = arith.constant 0 : i32
    %c0_i32_0 = arith.constant 0 : i32
    %c0_i32_1 = arith.constant 0 : i32
    return %c0_i32, %c0_i32_0 : i32, i32
  }
  func.func @transform_2(%arg0: i32) -> (i32, i32) {
    %c0_i32 = arith.constant 0 : i32
    %c0_i32_0 = arith.constant 0 : i32
    %c0_i32_1 = arith.constant 0 : i32
    return %c0_i32, %c0_i32_0 : i32, i32
  }
  func.func @transform_3(%arg0: i32) -> (i32, i32) {
    %c0_i32 = arith.constant 0 : i32
    %c0_i32_0 = arith.constant 0 : i32
    return %arg0, %c0_i32 : i32, i32
  }
}

</mosaic_0001>

<bundles_post_ra>
// kernel: tpu_custom_call.1
= control target key start
LH: loop header
LB: loop body
LE: loop exit
PB: predicated region body
PF: predicated region fallthrough
CT: control target
= control target key end

     0   :  { %8 = vsyncpa [#allocation3], 0  ;;  %s394_s0 = inlined_call_operand.hbm [shape: f32[1,256], index: 0, kind: input, shape index: {}]   ;;  %s395_s1 = inlined_call_operand.hbm [shape: f32[256,128], index: 1, kind: input, shape index: {}]   ;;  %s396_s2 = inlined_call_operand.vmem [shape: f32[1,128], index: 2, kind: input, shape index: {}]   ;;  %s397_s3 = inlined_call_operand.hbm [shape: f32[1,128], index: 3, kind: output, shape index: {}]  }
   0x1   :  { %9 = vsyncpa [#allocation6], 0 }
   0x2   :  { %10 = vsyncpa [#allocation4], 0  ;;  %s323_s12 = smov [#allocation2]   ;;  %s324_s14 = smov [#allocation5]  }
   0x3   :  { %s17_s13 = sshll.u32 %s323_s12, 4  ;;  %s26_s15 = sshll.u32 %s324_s14, 4  ;;  %s18_s13 = int_to_ptr.vmem [resolvable:$true] %s17_s13  ;;  %s348_s15 = int_to_ptr.vmem [resolvable:$true] %s26_s15 }
   0x4   :  { %s251_s18 = scalar_lea.hbm %s394_s0, 32 }
   0x5   :  { %p252_p0 = scmp.ne.s32.totalorder %s394_s0, %s251_s18  ;;  %p255_p1 = scmp.lt.u32.totalorder %s251_s18, %s394_s0 }
   0x7   :  { %p257_p2 = pnand %p255_p1, %p252_p0 }
   0x9   :  { %260 = shalt.err (!%p257_p2)
}
   0xa   :  { %s261_s23 = scalar_lea.vmem %s18_s13, 32  ;;  %p266_p4 = scmp.lt.s32.totalorder %s18_s13, %s18_s13 }
   0xb   :  { %p262_p3 = scmp.ne.s32.totalorder %s18_s13, %s261_s23  ;;  %p267_p5 = scmp.lt.s32.totalorder %s261_s23, %s261_s23 }
   0xd   :  { %p268_p6 = por %p267_p5, %p266_p4 }
   0xf   :  { %p269_p7 = pnand %p268_p6, %p262_p3 }
  0x11   :  { %272 = shalt.err (!%p269_p7)
}
  0x12   :  { %20 = dma.hbm_to_vmem [thread:$0]  %s394_s0, 32, %s18_s13, [#allocation3]  }
  0x13   :  { %s273_s28 = scalar_lea.hbm %s395_s1, 4096 }
  0x14   :  { %p274_p8 = scmp.ne.s32.totalorder %s395_s1, %s273_s28  ;;  %p277_p9 = scmp.lt.u32.totalorder %s273_s28, %s395_s1 }
  0x16   :  { %p279_p10 = pnand %p277_p9, %p274_p8 }
  0x18   :  { %282 = shalt.err (!%p279_p10)
}
  0x19   :  { %s283_s6 = scalar_lea.vmem %s348_s15, 4096  ;;  %p288_p12 = scmp.lt.s32.totalorder %s348_s15, %s348_s15 }
  0x1a   :  { %p284_p11 = scmp.ne.s32.totalorder %s348_s15, %s283_s6  ;;  %p289_p13 = scmp.lt.s32.totalorder %s283_s6, %s283_s6 }
  0x1c   :  { %p290_p0 = por %p289_p13, %p288_p12 }
  0x1e   :  { %p291_p1 = pnand %p290_p0, %p284_p11 }
  0x20   :  { %294 = shalt.err (!%p291_p1)
}
  0x21   :  { %s325_s0 = smov 128   ;;  %s326_s7 = smov 8  }
  0x22   :  { %32 = dma.hbm_to_vmem [thread:$0]  %s395_s1, 4096, %s348_s15, [#allocation6], %s325_s0, %s325_s0, %s326_s7  }
  0x23   :  { %317 = dma.done.wait [#allocation3], 32  }
  0x24   :  { %318 = vsyncadd [#allocation3], 4294967264 }
  0x25   :  { %319 = dma.done.wait [#allocation6], 4096  }
  0x26   :  { %320 = vsyncadd [#allocation6], 4294963200  ;;  %v76_v0 = vlaneseq  ;;  %v58_v1 = vld [vmem:[#allocation5 + $0x80] sm:$0xff]  ;;  %v59_v2 = vld [vmem:[#allocation5 + $0x88] sm:$0xff]  ;;  %s327_s11 = smov [#allocation7]  }
  0x27   :  { %v42_v3 = vld [vmem:[#allocation5] sm:$0xff]  ;;  %v212_v4 = vpack.c.bf16 %v59_v2, %v58_v1  ;;  %v43_v5 = vld [vmem:[#allocation5 + $0x8] sm:$0xff]  ;;  %v60_v6 = vld [vmem:[#allocation5 + $0x90] sm:$0xff]  ;;  %s167_s12 = sshll.u32 %s327_s11, 4  ;;  %s168_s12 = int_to_ptr.vmem [resolvable:$true] %s167_s12 }
  0x28   :  { %v61_v7 = vld [vmem:[#allocation5 + $0x98] sm:$0xff]  ;;  %v214_v8 = vpack.c.bf16 %v43_v5, %v42_v3  ;;  %v44_v10 = vld [vmem:[#allocation5 + $0x10] sm:$0xff]  ;;  %v62_v12 = vld [vmem:[#allocation5 + $0xa0] sm:$0xff]  ;;  %v77_v14 = vshrl.u32 %v76_v0, 7  ;;  %s295_s13 = scalar_lea.vmem %s168_s12, 16  ;;  %s299_s14 = scalar_lea.vmem %s168_s12, 32 }
  0x29   :  { %v216_v9 = vpack.c.bf16 %v61_v7, %v60_v6  ;;  %v45_v11 = vld [vmem:[#allocation5 + $0x18] sm:$0xff]  ;;  %213 = vmatprep.subr.bf16.mxu0 %v212_v4  ;;  %v63_v13 = vld [vmem:[#allocation5 + $0xa8] sm:$0xff]  ;;  %v46_v17 = vld [vmem:[#allocation5 + $0x20] sm:$0xff]  ;;  %p296_p2 = scmp.ne.s32.totalorder %s168_s12, %s295_s13  ;;  %p300_p3 = scmp.lt.s32.totalorder %s168_s12, %s168_s12 }
  0x2a   :  { %215 = vmatpush3.bf16.msra.mxu0 %v214_v8  ;;  %v218_v15 = vpack.c.bf16 %v45_v11, %v44_v10  ;;  %v220_v16 = vpack.c.bf16 %v63_v13, %v62_v12  ;;  %v47_v18 = vld [vmem:[#allocation5 + $0x28] sm:$0xff]  ;;  %v64_v19 = vld [vmem:[#allocation5 + $0xb0] sm:$0xff]  ;;  %v65_v20 = vld [vmem:[#allocation5 + $0xb8] sm:$0xff]  ;;  %v82_v21 = vsub.s32 1, %v77_v14  ;;  %v78_v52 = vsub.s32 0, %v77_v14  ;;  %p301_p4 = scmp.lt.s32.totalorder %s299_s14, %s295_s13 }
  0x2b   :  { %217 = vmatprep.subr.bf16.mxu0 %v216_v9  ;;  %v222_v22 = vpack.c.bf16 %v47_v18, %v46_v17  ;;  %v224_v23 = vpack.c.bf16 %v65_v20, %v64_v19  ;;  %v48_v24 = vld [vmem:[#allocation5 + $0x30] sm:$0xff]  ;;  %v49_v25 = vld [vmem:[#allocation5 + $0x38] sm:$0xff]  ;;  %v66_v26 = vld [vmem:[#allocation5 + $0xc0] sm:$0xff] }
  0x2c   :  { %v67_v27 = vld [vmem:[#allocation5 + $0xc8] sm:$0xff]  ;;  %v41_v28 = vld [vmem:[#allocation2] sm:$0x3]  ;;  %v226_v30 = vpack.c.bf16 %v49_v25, %v48_v24  ;;  %v50_v32 = vld [vmem:[#allocation5 + $0x40] sm:$0xff]  ;;  %p302_p5 = por %p301_p4, %p300_p3 }
  0x2d   :  { %v83_v29 = vrot.slane %v41_v28, %v82_v21  ;;  %v228_v31 = vpack.c.bf16 %v67_v27, %v66_v26  ;;  %v51_v33 = vld [vmem:[#allocation5 + $0x48] sm:$0xff]  ;;  %v68_v34 = vld [vmem:[#allocation5 + $0xd0] sm:$0xff]  ;;  %v69_v35 = vld [vmem:[#allocation5 + $0xd8] sm:$0xff]  ;;  %v79_v54 = vrot.slane %v41_v28, %v78_v52 }
  0x2e   :  { %219 = vmatpush3.bf16.msra.mxu0 %v218_v15  ;;  %v230_v36 = vpack.c.bf16 %v51_v33, %v50_v32  ;;  %v232_v37 = vpack.c.bf16 %v69_v35, %v68_v34  ;;  %v52_v38 = vld [vmem:[#allocation5 + $0x50] sm:$0xff]  ;;  %v53_v39 = vld [vmem:[#allocation5 + $0x58] sm:$0xff]  ;;  %v70_v40 = vld [vmem:[#allocation5 + $0xe0] sm:$0xff]  ;;  %p303_p6 = pnand %p302_p5, %p296_p2 }
  0x2f   :  { %221 = vmatprep.subr.bf16.mxu0 %v220_v16  ;;  %150 = vmatprep.mubr.f32.mxu0 %v83_v29  ;;  %v71_v41 = vld [vmem:[#allocation5 + $0xe8] sm:$0xff]  ;;  %v234_v42 = vpack.c.bf16 %v53_v39, %v52_v38  ;;  %v54_v44 = vld [vmem:[#allocation5 + $0x60] sm:$0xff]  ;;  %v72_v46 = vld [vmem:[#allocation5 + $0xf0] sm:$0xff] }
  0x30   :  { %v236_v43 = vpack.c.bf16 %v71_v41, %v70_v40  ;;  %v55_v45 = vld [vmem:[#allocation5 + $0x68] sm:$0xff]  ;;  %v73_v47 = vld [vmem:[#allocation5 + $0xf8] sm:$0xff]  ;;  %v56_v50 = vld [vmem:[#allocation5 + $0x70] sm:$0xff] }
  0x31   :  { %v238_v48 = vpack.c.bf16 %v55_v45, %v54_v44  ;;  %v240_v49 = vpack.c.bf16 %v73_v47, %v72_v46  ;;  %v57_v51 = vld [vmem:[#allocation5 + $0x78] sm:$0xff] }
  0x32   :  { %223 = vmatpush3.bf16.msra.mxu0 %v222_v22  ;;  %v242_v53 = vpack.c.bf16 %v57_v51, %v56_v50  ;;  %v74_v56 = vld [vmem:[%s396_s2] sm:$0x1] }
  0x33   :  { %225 = vmatprep.subr.bf16.mxu0 %v224_v23 }
  0x36   :  { %227 = vmatpush3.bf16.msra.mxu0 %v226_v30 }
  0x37   :  { %229 = vmatprep.subr.bf16.mxu0 %v228_v31 }
  0x3a   :  { %231 = vmatpush3.bf16.msra.mxu0 %v230_v36 }
  0x3b   :  { %233 = vmatprep.subr.bf16.mxu0 %v232_v37 }
  0x3e   :  { %235 = vmatpush3.bf16.msra.mxu0 %v234_v42 }
  0x3f   :  { %237 = vmatprep.subr.bf16.mxu0 %v236_v43 }
  0x42   :  { %239 = vmatpush3.bf16.msra.mxu0 %v238_v48 }
  0x43   :  { %241 = vmatprep.subr.bf16.mxu0 %v240_v49 }
  0x46   :  { %243 = vmatpush3.bf16.msra.mxu0 %v242_v53 }
  0x49   :  { %151 = vmatmul.mubr.f32.vlgmr.msra.gmra.mrb[0].mxu0 %v79_v54 }
 0x11c   :  { %v209_v55 = vpop.f32.mrb[0].mxu0 }
 0x11d   :  { %v210_v57 = vpop.f32.mrb[1].mxu0 }
 0x11e   :  { %v211_v58 = vadd.f32 %v210_v57, %v209_v55 }
 0x120   :  { %v153_v59 = vadd.f32 %v211_v58, %v74_v56 }
 0x122   :  { %v156_v60 = vmul.f32 0.5, %v153_v59 }
 0x124   :  { %249 = vtanh.f32 %v156_v60 }
 0x12e   :  { %v250_v61 = vpop.eup %249 }
 0x12f   :  { %v158_v62 = vmul.f32 0.5, %v250_v61 }
 0x131   :  { %v159_v63 = vadd.f32 0.5, %v158_v62 }
 0x133   :  { %160 = vst [vmem:[#allocation7] sm:$0x1] %v159_v63 }
 0x134   :  { %306 = shalt.err (!%p303_p6)
}
 0x135   :  { %s307_s16 = scalar_lea.hbm %s397_s3, 16 }
 0x136   :  { %p308_p7 = scmp.ne.s32.totalorder %s397_s3, %s307_s16  ;;  %p311_p8 = scmp.lt.u32.totalorder %s307_s16, %s397_s3 }
 0x138   :  { %p313_p9 = pnand %p311_p8, %p308_p7 }
 0x13a   :  { %316 = shalt.err (!%p313_p9)
}
 0x13b   :  { %170 = dma.vmem_to_hbm [thread:$0]  %s168_s12, 16, %s397_s3, [#allocation4]  }
 0x13c   :  { %321 = dma.done.wait [#allocation4], 16  }
 0x13d   :  { %322 = vsyncadd [#allocation4], 4294967280 }
 0x13e   :  { %174 = vsyncpa [#allocation3], 1 }
 0x13f   :  { %175 = vsyncpa [#allocation6], 1 }
 0x140   :  { %176 = vsyncpa [#allocation4], 1 }

</bundles_post_ra>
